<compile_context>
chip_gen: v7x
topology: tpu7x:2x2x1
jax: 0.10.0
libtpu: 0.0.40
codegen_flags: <defaults>
</compile_context>

<pallas_src>
import jax
import jax.numpy as jnp
from jax.experimental import pallas as pl
from jax.experimental.pallas import tpu as pltpu

EPS = 1e-5     # PyTorch BatchNorm2d default eps
BLOCK_N = 8    # samples per grid step (fills the 8-sublane vreg axis)


def _round_up(v, m):
    return (v + m - 1) // m * m


def conv_relu_bn(x, w, b, gamma, beta):
    """Fused Conv2d(stride=1, VALID) + ReLU + training-mode BatchNorm2d.

    x: (N, 1, H, W), w: (Cout, 1, KH, KW), b/gamma/beta: (Cout,)
    returns: (N, Cout, OH, OW) in NCHW.
    """
    N, Cin, H, W = x.shape
    Cout, Cin_w, KH, KW = w.shape
    assert Cin == Cin_w == 1, "module is Conv2d(1, 2, 2): single input channel"
    OH, OW = H - KH + 1, W - KW + 1

    # "Wide" flattened output: W entries per output row (last KW-1 per row are
    # garbage, masked to zero), padded to a lane-aligned width.
    OHW_WIDE = OH * W
    OHW_PAD = max(128, _round_up(OHW_WIDE, 128))
    # Flattened-input length so every shifted tap slice stays in bounds.
    off_max = (KH - 1) * W + (KW - 1)
    HW_PAD = _round_up(max(H * W, OHW_PAD + off_max), 128)

    B = BLOCK_N
    N_PAD = _round_up(N, B)
    n_blocks = N_PAD // B
    P_total = float(N * OH * OW)            # BN batch-statistic count per channel

    # ----------------- pass 1: conv + ReLU + partial BN stats -----------------
    def conv_kernel(x_ref, mask_ref, w_ref, b_ref, y_ref, sum_ref, ssq_ref):
        xv = x_ref[...]                      # (B, HW_PAD)
        mask = mask_ref[...]                 # (1, OHW_PAD) 0/1 f32 (grid-invariant)
        for c in range(Cout):
            acc = jnp.zeros((B, OHW_PAD), jnp.float32)
            for di in range(KH):
                for dj in range(KW):
                    off = di * W + dj
                    tap = c * KH * KW + di * KW + dj
                    # scalar (SMEM) weight * shifted lane slice: implicit im2col
                    acc = acc + w_ref[tap] * xv[:, off:off + OHW_PAD]
            a = jnp.maximum(acc + b_ref[c], 0.0) * mask   # bias + ReLU, zero pad cols
            y_ref[c] = a                                  # lane-dense streamed output
            # lane-reduced per-sample partial statistics (XLU path, off the VALU)
            sum_ref[c] = jnp.sum(a, axis=1, keepdims=True)
            ssq_ref[c] = jnp.sum(a * a, axis=1, keepdims=True)

    # host-side prep (pad only as far as the shifted slices require)
    x_flat = jnp.pad(x.reshape(N, H * W).astype(jnp.float32),
                     ((0, N_PAD - N), (0, HW_PAD - H * W)))
    col = jnp.arange(OHW_PAD)
    mask = ((col < OHW_WIDE) & ((col % W) < OW)).astype(jnp.float32).reshape(1, OHW_PAD)
    w_smem = w.reshape(Cout * KH * KW).astype(jnp.float32)
    b_smem = b.reshape(Cout).astype(jnp.float32)

    y_pre, sums, ssqs = pl.pallas_call(
        conv_kernel,
        out_shape=(
            jax.ShapeDtypeStruct((Cout, N_PAD, OHW_PAD), jnp.float32),  # pre-BN act
            jax.ShapeDtypeStruct((Cout, N_PAD, 1), jnp.float32),        # per-sample sum
            jax.ShapeDtypeStruct((Cout, N_PAD, 1), jnp.float32),        # per-sample sum sq
        ),
        grid=(n_blocks,),
        in_specs=[
            pl.BlockSpec((B, HW_PAD), lambda n: (n, 0)),                # sample block
            pl.BlockSpec((1, OHW_PAD), lambda n: (0, 0)),               # validity mask
            pl.BlockSpec(memory_space=pltpu.MemorySpace.SMEM),          # conv weights
            pl.BlockSpec(memory_space=pltpu.MemorySpace.SMEM),          # conv bias
        ],
        out_specs=(
            pl.BlockSpec((Cout, B, OHW_PAD), lambda n: (0, n, 0)),
            pl.BlockSpec((Cout, B, 1), lambda n: (0, n, 0)),
            pl.BlockSpec((Cout, B, 1), lambda n: (0, n, 0)),
        ),
        compiler_params=pltpu.CompilerParams(dimension_semantics=("parallel",)),
    )(x_flat, mask, w_smem, b_smem)

    # ------------- tiny JAX reduction: fold BN into scale / shift -------------
    s = jnp.sum(sums[:, :N, 0], axis=1)                    # (Cout,)  (padded rows excluded)
    ss = jnp.sum(ssqs[:, :N, 0], axis=1)
    mean = s / P_total
    var = jnp.maximum(ss / P_total - mean * mean, 0.0)     # biased var, clamp cancellation
    scale = gamma.astype(jnp.float32) * jax.lax.rsqrt(var + EPS)   # (Cout,)
    shift = beta.astype(jnp.float32) - mean * scale                # (Cout,)

    # ----------------- pass 2: streamed per-channel scale/shift ---------------
    def bn_kernel(y_ref, scale_ref, shift_ref, o_ref):
        for c in range(Cout):
            o_ref[c] = y_ref[c] * scale_ref[c] + shift_ref[c]

    y_bn = pl.pallas_call(
        bn_kernel,
        out_shape=jax.ShapeDtypeStruct((Cout, N_PAD, OHW_PAD), jnp.float32),
        grid=(n_blocks,),
        in_specs=[
            pl.BlockSpec((Cout, B, OHW_PAD), lambda n: (0, n, 0)),
            pl.BlockSpec(memory_space=pltpu.MemorySpace.SMEM),   # scale
            pl.BlockSpec(memory_space=pltpu.MemorySpace.SMEM),   # shift
        ],
        out_specs=pl.BlockSpec((Cout, B, OHW_PAD), lambda n: (0, n, 0)),
        input_output_aliases={0: 0},                             # in-place over y_pre
        compiler_params=pltpu.CompilerParams(dimension_semantics=("parallel",)),
    )(y_pre, scale, shift)

    # Strip wide-layout / batch padding -> NCHW (wrapper-side layout plumbing,
    # tiny relative to the kernel output here).
    y = y_bn[:, :N, :OHW_WIDE].reshape(Cout, N, OH, W)[:, :, :, :OW]
    return jnp.transpose(y, (1, 0, 2, 3))


def model_forward(x, conv_w, conv_b, bn_gamma, bn_beta):
    y1 = conv_relu_bn(x, conv_w, conv_b, bn_gamma, bn_beta)
    # TODO(synk): second conv1(y1)/bn stage is shape-invalid in the reference
    # (channel mismatch RuntimeError) and is omitted rather than faked.
    return y1


def _reference(x, w, b, gamma, beta):
    """Pure-JAX reference: conv -> ReLU -> training-mode BatchNorm2d."""
    y = jax.lax.conv(x.astype(jnp.float32), w.astype(jnp.float32), (1, 1), "VALID")
    y = y + b.reshape(1, -1, 1, 1)
    a = jnp.maximum(y, 0.0)
    mean = jnp.mean(a, axis=(0, 2, 3), keepdims=True)
    var = jnp.mean((a - mean) ** 2, axis=(0, 2, 3), keepdims=True)
    return ((a - mean) * jax.lax.rsqrt(var + EPS) * gamma.reshape(1, -1, 1, 1)
            + beta.reshape(1, -1, 1, 1))


if __name__ == "__main__":
    key = jax.random.PRNGKey(0)
    kx, kw, kb = jax.random.split(key, 3)

    # Shapes implied by the module: Conv2d(1, 2, kernel_size=2) on 1-channel
    # images. N=12 exercises both multi-block streaming (2 grid steps at B=8)
    # and the padded-sample path while staying small.
    N, Cin, H, W = 12, 1, 16, 16
    Cout, KH, KW = 2, 2, 2
    x = jax.random.normal(kx, (N, Cin, H, W), dtype=jnp.float32)

    # Deterministic Conv2d-style init: bound = 1/sqrt(fan_in)
    bound = 1.0 / float((Cin * KH * KW) ** 0.5)
    conv_w = jax.random.uniform(kw, (Cout, Cin, KH, KW), jnp.float32, -bound, bound)
    conv_b = jax.random.uniform(kb, (Cout,), jnp.float32, -bound, bound)

    # BatchNorm2d default init
    bn_gamma = jnp.ones((Cout,), jnp.float32)
    bn_beta = jnp.zeros((Cout,), jnp.float32)

    y = model_forward(x, conv_w, conv_b, bn_gamma, bn_beta)
    jax.block_until_ready(y)
    assert y.shape == (N, Cout, H - KH + 1, W - KW + 1)

    ref = _reference(x, conv_w, conv_b, bn_gamma, bn_beta)
    err = float(jnp.max(jnp.abs(y - ref)))
    assert err < 1e-3, f"mismatch vs reference: max abs err {err}"
    print("KERNEL_OK")
</pallas_src>

<mosaic_0001>
module attributes {stable_mosaic.version = 11 : i64} {
  func.func @conv_kernel(%arg0: i32, %arg1: memref<8x384xf32, #tpu.memory_space<vmem>>, %arg2: memref<1x256xf32, #tpu.memory_space<vmem>>, %arg3: memref<8xf32, #tpu.memory_space<smem>>, %arg4: memref<2xf32, #tpu.memory_space<smem>>, %arg5: memref<2x8x256xf32, #tpu.memory_space<vmem>>, %arg6: memref<2x8x1xf32, #tpu.memory_space<vmem>>, %arg7: memref<2x8x1xf32, #tpu.memory_space<vmem>>) attributes {dimension_semantics = [#tpu.dimension_semantics<parallel>], iteration_bounds = array<i64: 2>, scalar_prefetch = 0 : i64, scratch_operands = 0 : i64, tpu.core_type = #tpu.core_type<tc>, window_params = [{transform_indices = @transform_0, window_bounds = array<i64: 8, 384>}, {pipeline_mode = #tpu.pipeline_mode<synchronous>, transform_indices = @transform_1, window_bounds = array<i64: 1, 256>}, {transform_indices = @transform_2, window_bounds = array<i64: 8>}, {transform_indices = @transform_3, window_bounds = array<i64: 2>}, {transform_indices = @transform_4, window_bounds = array<i64: 2, 8, 256>}, {transform_indices = @transform_5, window_bounds = array<i64: 2, 8, 1>}, {transform_indices = @transform_6, window_bounds = array<i64: 2, 8, 1>}]} {
    %c0 = arith.constant 0 : index
    %c0_0 = arith.constant 0 : index
    %0 = vector.load %arg1[%c0, %c0_0] : memref<8x384xf32, #tpu.memory_space<vmem>>, vector<8x384xf32>
    %c0_1 = arith.constant 0 : index
    %c0_2 = arith.constant 0 : index
    %1 = vector.load %arg2[%c0_1, %c0_2] : memref<1x256xf32, #tpu.memory_space<vmem>>, vector<1x256xf32>
    %cst = arith.constant 0.000000e+00 : f32
    %2 = vector.broadcast %cst : f32 to vector<8x256xf32>
    %c0_3 = arith.constant 0 : index
    %3 = memref.load %arg3[%c0_3] : memref<8xf32, #tpu.memory_space<smem>>
    %4 = vector.extract_strided_slice %0 {offsets = [0, 0], sizes = [8, 256], strides = [1, 1]} : vector<8x384xf32> to vector<8x256xf32>
    %5 = vector.broadcast %3 : f32 to vector<8x256xf32>
    %6 = arith.mulf %5, %4 : vector<8x256xf32>
    %7 = arith.addf %2, %6 : vector<8x256xf32>
    %c1 = arith.constant 1 : index
    %8 = memref.load %arg3[%c1] : memref<8xf32, #tpu.memory_space<smem>>
    %9 = vector.extract_strided_slice %0 {offsets = [0, 1], sizes = [8, 256], strides = [1, 1]} : vector<8x384xf32> to vector<8x256xf32>
    %10 = vector.broadcast %8 : f32 to vector<8x256xf32>
    %11 = arith.mulf %10, %9 : vector<8x256xf32>
    %12 = arith.addf %7, %11 : vector<8x256xf32>
    %c2 = arith.constant 2 : index
    %13 = memref.load %arg3[%c2] : memref<8xf32, #tpu.memory_space<smem>>
    %14 = vector.extract_strided_slice %0 {offsets = [0, 16], sizes = [8, 256], strides = [1, 1]} : vector<8x384xf32> to vector<8x256xf32>
    %15 = vector.broadcast %13 : f32 to vector<8x256xf32>
    %16 = arith.mulf %15, %14 : vector<8x256xf32>
    %17 = arith.addf %12, %16 : vector<8x256xf32>
    %c3 = arith.constant 3 : index
    %18 = memref.load %arg3[%c3] : memref<8xf32, #tpu.memory_space<smem>>
    %19 = vector.extract_strided_slice %0 {offsets = [0, 17], sizes = [8, 256], strides = [1, 1]} : vector<8x384xf32> to vector<8x256xf32>
    %20 = vector.broadcast %18 : f32 to vector<8x256xf32>
    %21 = arith.mulf %20, %19 : vector<8x256xf32>
    %22 = arith.addf %17, %21 : vector<8x256xf32>
    %c0_4 = arith.constant 0 : index
    %23 = memref.load %arg4[%c0_4] : memref<2xf32, #tpu.memory_space<smem>>
    %24 = vector.broadcast %23 : f32 to vector<8x256xf32>
    %25 = arith.addf %22, %24 : vector<8x256xf32>
    %cst_5 = arith.constant 0.000000e+00 : f32
    %26 = vector.broadcast %cst_5 : f32 to vector<8x256xf32>
    %27 = arith.maximumf %25, %26 : vector<8x256xf32>
    %28 = vector.broadcast %1 : vector<1x256xf32> to vector<8x256xf32>
    %29 = arith.mulf %27, %28 : vector<8x256xf32>
    %c0_6 = arith.constant 0 : index
    %c0_7 = arith.constant 0 : index
    %c0_8 = arith.constant 0 : index
    %30 = vector.load %arg5[%c0_6, %c0_7, %c0_8] : memref<2x8x256xf32, #tpu.memory_space<vmem>>, vector<1x8x256xf32>
    %31 = vector.shape_cast %30 : vector<1x8x256xf32> to vector<8x256xf32>
    %32 = vector.shape_cast %29 : vector<8x256xf32> to vector<1x8x256xf32>
    tpu.vector_store %arg5[%c0_6, %c0_7, %c0_8], %32 {strides = array<i32>} : memref<2x8x256xf32, #tpu.memory_space<vmem>>, vector<1x8x256xf32>,
    %cst_9 = arith.constant dense<0.000000e+00> : vector<8xf32>
    %33 = vector.multi_reduction <add>, %29, %cst_9 [1] : vector<8x256xf32> to vector<8xf32>
    %34 = vector.shape_cast %33 : vector<8xf32> to vector<8x1xf32>
    %c0_10 = arith.constant 0 : index
    %c0_11 = arith.constant 0 : index
    %c0_12 = arith.constant 0 : index
    %35 = vector.load %arg6[%c0_10, %c0_11, %c0_12] : memref<2x8x1xf32, #tpu.memory_space<vmem>>, vector<1x8x1xf32>
    %36 = vector.shape_cast %35 : vector<1x8x1xf32> to vector<8x1xf32>
    %37 = vector.shape_cast %34 : vector<8x1xf32> to vector<1x8x1xf32>
    tpu.vector_store %arg6[%c0_10, %c0_11, %c0_12], %37 {strides = array<i32>} : memref<2x8x1xf32, #tpu.memory_space<vmem>>, vector<1x8x1xf32>,
    %38 = arith.mulf %29, %29 : vector<8x256xf32>
    %cst_13 = arith.constant dense<0.000000e+00> : vector<8xf32>
    %39 = vector.multi_reduction <add>, %38, %cst_13 [1] : vector<8x256xf32> to vector<8xf32>
    %40 = vector.shape_cast %39 : vector<8xf32> to vector<8x1xf32>
    %c0_14 = arith.constant 0 : index
    %c0_15 = arith.constant 0 : index
    %c0_16 = arith.constant 0 : index
    %41 = vector.load %arg7[%c0_14, %c0_15, %c0_16] : memref<2x8x1xf32, #tpu.memory_space<vmem>>, vector<1x8x1xf32>
    %42 = vector.shape_cast %41 : vector<1x8x1xf32> to vector<8x1xf32>
    %43 = vector.shape_cast %40 : vector<8x1xf32> to vector<1x8x1xf32>
    tpu.vector_store %arg7[%c0_14, %c0_15, %c0_16], %43 {strides = array<i32>} : memref<2x8x1xf32, #tpu.memory_space<vmem>>, vector<1x8x1xf32>,
    %cst_17 = arith.constant 0.000000e+00 : f32
    %44 = vector.broadcast %cst_17 : f32 to vector<8x256xf32>
    %c4 = arith.constant 4 : index
    %45 = memref.load %arg3[%c4] : memref<8xf32, #tpu.memory_space<smem>>
    %46 = vector.extract_strided_slice %0 {offsets = [0, 0], sizes = [8, 256], strides = [1, 1]} : vector<8x384xf32> to vector<8x256xf32>
    %47 = vector.broadcast %45 : f32 to vector<8x256xf32>
    %48 = arith.mulf %47, %46 : vector<8x256xf32>
    %49 = arith.addf %44, %48 : vector<8x256xf32>
    %c5 = arith.constant 5 : index
    %50 = memref.load %arg3[%c5] : memref<8xf32, #tpu.memory_space<smem>>
    %51 = vector.extract_strided_slice %0 {offsets = [0, 1], sizes = [8, 256], strides = [1, 1]} : vector<8x384xf32> to vector<8x256xf32>
    %52 = vector.broadcast %50 : f32 to vector<8x256xf32>
    %53 = arith.mulf %52, %51 : vector<8x256xf32>
    %54 = arith.addf %49, %53 : vector<8x256xf32>
    %c6 = arith.constant 6 : index
    %55 = memref.load %arg3[%c6] : memref<8xf32, #tpu.memory_space<smem>>
    %56 = vector.extract_strided_slice %0 {offsets = [0, 16], sizes = [8, 256], strides = [1, 1]} : vector<8x384xf32> to vector<8x256xf32>
    %57 = vector.broadcast %55 : f32 to vector<8x256xf32>
    %58 = arith.mulf %57, %56 : vector<8x256xf32>
    %59 = arith.addf %54, %58 : vector<8x256xf32>
    %c7 = arith.constant 7 : index
    %60 = memref.load %arg3[%c7] : memref<8xf32, #tpu.memory_space<smem>>
    %61 = vector.extract_strided_slice %0 {offsets = [0, 17], sizes = [8, 256], strides = [1, 1]} : vector<8x384xf32> to vector<8x256xf32>
    %62 = vector.broadcast %60 : f32 to vector<8x256xf32>
    %63 = arith.mulf %62, %61 : vector<8x256xf32>
    %64 = arith.addf %59, %63 : vector<8x256xf32>
    %c1_18 = arith.constant 1 : index
    %65 = memref.load %arg4[%c1_18] : memref<2xf32, #tpu.memory_space<smem>>
    %66 = vector.broadcast %65 : f32 to vector<8x256xf32>
    %67 = arith.addf %64, %66 : vector<8x256xf32>
    %cst_19 = arith.constant 0.000000e+00 : f32
    %68 = vector.broadcast %cst_19 : f32 to vector<8x256xf32>
    %69 = arith.maximumf %67, %68 : vector<8x256xf32>
    %70 = vector.broadcast %1 : vector<1x256xf32> to vector<8x256xf32>
    %71 = arith.mulf %69, %70 : vector<8x256xf32>
    %c1_20 = arith.constant 1 : index
    %c0_21 = arith.constant 0 : index
    %c0_22 = arith.constant 0 : index
    %72 = vector.load %arg5[%c1_20, %c0_21, %c0_22] : memref<2x8x256xf32, #tpu.memory_space<vmem>>, vector<1x8x256xf32>
    %73 = vector.shape_cast %72 : vector<1x8x256xf32> to vector<8x256xf32>
    %74 = vector.shape_cast %71 : vector<8x256xf32> to vector<1x8x256xf32>
    tpu.vector_store %arg5[%c1_20, %c0_21, %c0_22], %74 {strides = array<i32>} : memref<2x8x256xf32, #tpu.memory_space<vmem>>, vector<1x8x256xf32>,
    %cst_23 = arith.constant dense<0.000000e+00> : vector<8xf32>
    %75 = vector.multi_reduction <add>, %71, %cst_23 [1] : vector<8x256xf32> to vector<8xf32>
    %76 = vector.shape_cast %75 : vector<8xf32> to vector<8x1xf32>
    %c1_24 = arith.constant 1 : index
    %c0_25 = arith.constant 0 : index
    %c0_26 = arith.constant 0 : index
    %77 = vector.load %arg6[%c1_24, %c0_25, %c0_26] : memref<2x8x1xf32, #tpu.memory_space<vmem>>, vector<1x8x1xf32>
    %78 = vector.shape_cast %77 : vector<1x8x1xf32> to vector<8x1xf32>
    %79 = vector.shape_cast %76 : vector<8x1xf32> to vector<1x8x1xf32>
    tpu.vector_store %arg6[%c1_24, %c0_25, %c0_26], %79 {strides = array<i32>} : memref<2x8x1xf32, #tpu.memory_space<vmem>>, vector<1x8x1xf32>,
    %80 = arith.mulf %71, %71 : vector<8x256xf32>
    %cst_27 = arith.constant dense<0.000000e+00> : vector<8xf32>
    %81 = vector.multi_reduction <add>, %80, %cst_27 [1] : vector<8x256xf32> to vector<8xf32>
    %82 = vector.shape_cast %81 : vector<8xf32> to vector<8x1xf32>
    %c1_28 = arith.constant 1 : index
    %c0_29 = arith.constant 0 : index
    %c0_30 = arith.constant 0 : index
    %83 = vector.load %arg7[%c1_28, %c0_29, %c0_30] : memref<2x8x1xf32, #tpu.memory_space<vmem>>, vector<1x8x1xf32>
    %84 = vector.shape_cast %83 : vector<1x8x1xf32> to vector<8x1xf32>
    %85 = vector.shape_cast %82 : vector<8x1xf32> to vector<1x8x1xf32>
    tpu.vector_store %arg7[%c1_28, %c0_29, %c0_30], %85 {strides = array<i32>} : memref<2x8x1xf32, #tpu.memory_space<vmem>>, vector<1x8x1xf32>,
    return
  }
  func.func @transform_0(%arg0: i32) -> (i32, i32) {
    %c0_i32 = arith.constant 0 : i32
    %c0_i32_0 = arith.constant 0 : i32
    return %arg0, %c0_i32 : i32, i32
  }
  func.func @transform_1(%arg0: i32) -> (i32, i32) {
    %c0_i32 = arith.constant 0 : i32
    %c0_i32_0 = arith.constant 0 : i32
    %c0_i32_1 = arith.constant 0 : i32
    return %c0_i32, %c0_i32_0 : i32, i32
  }
  func.func @transform_2(%arg0: i32) -> i32 {
    %c0_i32 = arith.constant 0 : i32
    %c0_i32_0 = arith.constant 0 : i32
    return %c0_i32 : i32
  }
  func.func @transform_3(%arg0: i32) -> i32 {
    %c0_i32 = arith.constant 0 : i32
    %c0_i32_0 = arith.constant 0 : i32
    return %c0_i32 : i32
  }
  func.func @transform_4(%arg0: i32) -> (i32, i32, i32) {
    %c0_i32 = arith.constant 0 : i32
    %c0_i32_0 = arith.constant 0 : i32
    %c0_i32_1 = arith.constant 0 : i32
    return %c0_i32, %arg0, %c0_i32_0 : i32, i32, i32
  }
  func.func @transform_5(%arg0: i32) -> (i32, i32, i32) {
    %c0_i32 = arith.constant 0 : i32
    %c0_i32_0 = arith.constant 0 : i32
    %c0_i32_1 = arith.constant 0 : i32
    return %c0_i32, %arg0, %c0_i32_0 : i32, i32, i32
  }
  func.func @transform_6(%arg0: i32) -> (i32, i32, i32) {
    %c0_i32 = arith.constant 0 : i32
    %c0_i32_0 = arith.constant 0 : i32
    %c0_i32_1 = arith.constant 0 : i32
    return %c0_i32, %arg0, %c0_i32_0 : i32, i32, i32
  }
}

</mosaic_0001>

<bundles_post_ra>
// kernel: tpu_custom_call.1
= control target key start
LH: loop header
LB: loop body
LE: loop exit
PB: predicated region body
PF: predicated region fallthrough
CT: control target
= control target key end

     0   :  { %12 = vsyncpa [#allocation3], 0  ;;  %s1294_s0 = inlined_call_operand.hbm [shape: f32[16,384], index: 0, kind: input, shape index: {}]   ;;  %s1295_s1 = inlined_call_operand.vmem [shape: f32[1,256], index: 1, kind: input, shape index: {}]   ;;  %s1296_s2 = inlined_call_operand.vmem [shape: f32[8], index: 2, kind: input, shape index: {}]   ;;  %s1297_s3 = inlined_call_operand.vmem [shape: f32[2], index: 3, kind: input, shape index: {}]   ;;  %s1298_s4 = inlined_call_operand.hbm [shape: f32[2,16,256], index: 4, kind: output, shape index: {0}]   ;;  %s1299_s5 = inlined_call_operand.vmem [shape: f32[2,16,1], index: 5, kind: output, shape index: {1}]   ;;  %s1300_s6 = inlined_call_operand.vmem [shape: f32[2,16,1], index: 6, kind: output, shape index: {2}]  }
   0x1   :  { %14 = vsyncpa [#allocation3 + $0x1], 0 }
   0x2   :  { %15 = vsyncpa [#allocation5], 0 }
   0x3   :  { %16 = vsyncpa [#allocation8], 0 }
   0x4   :  { %17 = vsyncpa [#allocation4], 0 }
   0x5   :  { %19 = vsyncpa [#allocation4 + $0x1], 0  ;;  %s1048_s21 = smov 0   ;;  %s1050_s22 = smov 0  }
   0x6   :  { %s1052_s23 = smov 0   ;;  %s1054_s24 = smov 0  }
   0x7 LB: > { %s1069_s25 = sadd.s32 4294967295, %s1001_s24   ;;  %s757_s26 = sadd.s32 4294967294, %s1001_s24   ;;  %s1001_s24 = sphi %s1054_s24, %s1322_s24   ;;  %s997_s23 = sphi %s1052_s23, %s1321_s23   ;;  %s993_s22 = sphi %s1050_s22, %s1320_s22   ;;  %s989_s21 = sphi %s1048_s21, %s1319_s21  }
   0x8   : > { %p45_p0 = scmp.ne.s32.totalorder %s993_s22, %s989_s21  ;;  %p1301_p1 = scmp.eq.s32.totalorder %s1069_s25, 0 }
   0x9   : > { %p138_p3 = scmp.eq.s32.totalorder %s757_s26, 1  ;;  %p758_p5 = scmp.ge.s32.totalorder %s1001_s24, 1 }
   0xa   : > { %p1078_p4 = por %p1301_p1, %p45_p0  ;;  %p197_p7 = scmp.lt.s32.totalorder %s1001_s24, 3 }
   0xb   : > { %p1083_p6 = por %p138_p3, %p45_p0  ;;  %s213_s7 = sshll.u32 %s1296_s2, 4  ;;  %s214_s7 = int_to_ptr.vmem [resolvable:$true] %s213_s7 }
   0xc   : > { %s1304_s27 = scalar_select %p1078_p4, 1, 0 }
   0xd   : > { %s1305_s28 = scalar_select %p1083_p6, 1, 0 }
   0xe   : > { %p1091_p8 = pnand %p758_p5, %p197_p7  ;;  %s224_s11 = sshll.u32 %s1297_s3, 4  ;;  %s225_s11 = int_to_ptr.vmem [resolvable:$true] %s224_s11 }
   0xf   : > { %s1108_s13 = sadd.s32 1, %s1001_s24   ;;  %s867_s15 = scalar_lea.vmem %s214_s7, 16 }
  0x10   : > { %s1306_s8 = scalar_select %p1091_p8, 1, 0 }
  0x11   : > { %p806_p10 = pneg %p1091_p8  ;;  %s29_s14 = ssub.s32 %s1001_s24, %s1108_s13 }
  0x12   : > { %p868_p12 = scmp.ne.s32.totalorder %s214_s7, %s867_s15  ;;  %p875_p5 = scmp.lt.s32.totalorder %s214_s7, %s214_s7 }
  0x13   : > { %p1103_p11 = pnand %p806_p10, %p1301_p1  ;;  %p876_p7 = scmp.lt.s32.totalorder %s867_s15, %s867_s15 }
  0x15   : > { %p869_p13 = pneg %p1103_p11  ;;  %p877_p9 = por %p876_p7, %p875_p5 }
  0x17   : > { %p870_p0 = pnand %p869_p13, %p868_p12 }
  0x19   : > { %p871_p3 = pneg %p870_p0 }
  0x1b   : > { %p878_p2 = pnand %p877_p9, %p871_p3 }
  0x1d   : > { %881 = shalt.err (!%p878_p2)
}
  0x1e   : > { %s1003_s16 = smov [#allocation6]   ;;  %s882_s17 = scalar_lea.vmem %s225_s11, 16 }
  0x1f   : > { %809 = dma.vmem_to_smem (!%p1103_p11), %s214_s7, 16, %s1003_s16, [#allocation5]  }
  0x20   : > { %p883_p10 = scmp.ne.s32.totalorder %s225_s11, %s882_s17  ;;  %p890_p4 = scmp.lt.s32.totalorder %s225_s11, %s225_s11 }
  0x21   : > { %p891_p8 = scmp.lt.s32.totalorder %s882_s17, %s882_s17 }
  0x22   : > { %p885_p1 = pnand %p883_p10, %p869_p13 }
  0x23   : > { %p892_p12 = por %p891_p8, %p890_p4 }
  0x24   : > { %p886_p6 = pneg %p885_p1 }
  0x26   : > { %p893_p0 = pnand %p892_p12, %p886_p6 }
  0x28   : > { %896 = shalt.err (!%p893_p0)
}
  0x29   : > { %s1004_s18 = smov [#allocation7]   ;;  %p30_p2 = scmp.eq.s32.totalorder %s29_s14, 0 }
  0x2a   : > { %812 = dma.vmem_to_smem (!%p1103_p11), %s225_s11, 16, %s1004_s18, [#allocation8]  }
  0x2b   : > { %s32_s19 = sadd.s32 1, %s997_s23  ;;  %p39_p1 = scmp.ne.s32.totalorder %s997_s23, %s993_s22 }
  0x2c   : > { %p40_p9 = scmp.eq.s32.totalorder %s1001_s24, 0  ;;  %p1308_p6 = scmp.eq.s32.totalorder %s1069_s25, 1 }
  0x2d   : > { %s1123_s20 = scalar_select %p30_p2, %s997_s23, %s32_s19  }
  0x2e   : > { %p41_p4 = por %p40_p9, %p39_p1  ;;  %p1127_p8 = por %p1308_p6, %p39_p1 }
  0x2f   : > { %p823_p13 = scmp.lt.s32.totalorder %s1001_s24, 2  ;;  %s235_s29 = sand.u32 1, %s997_s23  }
  0x30   : > { %s791_s30 = smul.u32 24, %s235_s29  ;;  %s236_s16 = scalar_lea.sflag [#allocation3], %s235_s29 }
  0x31   : > { %s792_s7 = smul.u32 384, %s1001_s24  ;;  %p1134_p3 = pnand %p823_p13, %p41_p4 }
  0x32   : > { %s239_s14 = scalar_lea.vmem [#allocation2], %s791_s30 }
  0x33   : > { %s1141_s12 = scalar_lea.hbm %s1294_s0, %s792_s7  ;;  %s247_s15 = sshll.u32 %s239_s14, 4  ;;  %s1143_s15 = int_to_ptr.vmem [resolvable:$true] %s247_s15 }
  0x34   : > { %s897_s17 = scalar_lea.hbm %s1141_s12, 384  ;;  %p899_p5 = pneg %p1134_p3 }
  0x35   : > { %p898_p11 = scmp.ne.s32.totalorder %s1141_s12, %s897_s17  ;;  %s902_s7 = scalar_lea.hbm %s1294_s0, 768 }
  0x36   : > { %p903_p12 = scmp.lt.u32.totalorder %s1141_s12, %s1294_s0  ;;  %p904_p0 = scmp.lt.u32.totalorder %s902_s7, %s897_s17 }
  0x37   : > { %p900_p7 = pnand %p899_p5, %p898_p11  ;;  %p906_p1 = scmp.lt.u32.totalorder %s897_s17, %s1141_s12 }
  0x38   : > { %p905_p2 = por %p904_p0, %p903_p12 }
  0x39   : > { %p901_p10 = pneg %p900_p7 }
  0x3a   : > { %p907_p9 = por %p906_p1, %p905_p2 }
  0x3c   : > { %p908_p4 = pnand %p907_p9, %p901_p10 }
  0x3e   : > { %911 = shalt.err (!%p908_p4)
}
  0x3f   : > { %s912_s29 = scalar_lea.vmem %s1143_s15, 384  ;;  %s1005_s30 = smov [#allocation2]  }
  0x40   : > { %p913_p6 = scmp.ne.s32.totalorder %s1143_s15, %s912_s29  ;;  %s917_s14 = sshll.u32 %s1005_s30, 4  ;;  %s918_s14 = int_to_ptr.vmem [resolvable:$false] %s917_s14 }
  0x41   : > { %s919_s18 = scalar_lea.vmem %s918_s14, 768  ;;  %p920_p7 = scmp.lt.s32.totalorder %s1143_s15, %s918_s14 }
  0x42   : > { %p915_p13 = pnand %p913_p6, %p899_p5  ;;  %p921_p12 = scmp.lt.s32.totalorder %s919_s18, %s912_s29 }
  0x44   : > { %p916_p11 = pneg %p915_p13  ;;  %p922_p0 = por %p921_p12, %p920_p7 }
  0x46   : > { %p923_p2 = pnand %p922_p0, %p916_p11 }
  0x48   : > { %926 = shalt.err (!%p923_p2)
}
  0x49   : > { %816 = dma.hbm_to_vmem [thread:$0]  (!%p1134_p3), %s1141_s12, 384, %s1143_s15, %s236_s16  }
  0x4a   : > { %p1311_p10 = scmp.ne.s32.totalorder %s1306_s8, 0 }
  0x4b   : > { %s1173_s17 = sand.u32 (!%p1311_p10), 1, %s993_s22   ;;  %p1312_p5 = scmp.ne.s32.totalorder (!%p1311_p10), %s1304_s27, 0 }
  0x4c   : > { %256 = sbr.rel (%p1311_p10) target bundleno = 419 (0x1a3), region = 36  ;;  %s259_s7 = scalar_lea.sflag (!%p1311_p10), [#allocation3], %s1173_s17 }
  0x4d   : > { %s793_s19 = smul.u32 (!%p1311_p10), 24, %s1173_s17 }
  0x4f   : > { %s262_s10 = scalar_lea.vmem (!%p1311_p10), [#allocation2], %s793_s19 }
  0x53   : > { %972 = dma.done.wait (%p1312_p5), %s259_s7, 384  }
  0x54   : > { %974 = vsyncadd (%p1312_p5), %s259_s7, 4294966912  ;;  %p1313_p1 = scmp.eq.s32.totalorder %s1069_s25, 0 }
  0x56   : > { %976 = dma.done.wait (%p1313_p1), [#allocation5], 16   ;;  %p1314_p3 = pmov %p1313_p1 }
  0x57   : > { %p1315_p9 = pmov %p1313_p1 }
  0x58   : > { %978 = vsyncadd (%p1314_p3), [#allocation5], 4294967280 }
  0x59   : > { %980 = dma.done.wait (%p1315_p9), [#allocation8], 16   ;;  %p1316_p4 = pmov %p1313_p1 }
  0x5b   : > { %982 = vsyncadd (%p1316_p4), [#allocation8], 4294967280 }
  0x5c   : > { %275 = sfence }
  0x5d   : > { %s769_s8 = sld [smem:[#allocation6 + $0x1]]  ;;  %s773_s9 = sld [smem:[#allocation6 + $0x5]]  ;;  %v310_v0 = vld [vmem:[%s262_s10 + $0x10] sm:$0xff]  ;;  %v1189_v1 = vld [vmem:[%s262_s10] sm:$0xff]  ;;  %v1191_v3 = vld [vmem:[%s262_s10 + $0x8] sm:$0xff]  ;;  %vm332_vm0 = vcmask 1039360   ;;  %v388_v38 = vlaneseq }
  0x5e   : > { %s770_s27 = sld [smem:[#allocation6 + $0x2]]  ;;  %s1006_s12 = smov 127   ;;  %vm353_vm1 = vcmask 916480   ;;  %vm374_vm2 = vcmask 908288   ;;  %v311_v56 = vld [vmem:[%s1295_s1] sm:$0x3] }
  0x5f   : > { %s774_s15 = sld [smem:[#allocation6 + $0x6]]  ;;  %s771_s16 = sld [smem:[#allocation6 + $0x3]]  ;;  %v389_v43 = vshrl.u32 %v388_v38, 7 }
  0x60   : > { %s1007_s11 = smov 112   ;;  %s775_s29 = sld [smem:[#allocation6 + $0x7]] }
  0x61   : > { %s1008_s30 = smov 111   ;;  %s312_s14 = sld [smem:[#allocation6]]  ;;  %v390_v52 = vsub.s32 0, %v389_v43  ;;  %v394_v63 = vsub.s32 1, %v389_v43 }
  0x62   : > { %s772_s18 = sld [smem:[#allocation6 + $0x4]]  ;;  %s1205_s19 = sld [smem:[#allocation7]] }
  0x63   : > { %v319_v2 = vstv %s769_s8  ;;  %v420_v6 = vstv %s773_s9  ;;  %s1215_s7 = sld [smem:[#allocation7 + $0x1]]  ;;  %s766_s9 = sshll.u32 %s1173_s17, 5 }
  0x64   : > { %v322_v4 = vmul.f32 %v319_v2, %v310_v0  ;;  %v320_v5 = vmul.f32 %v319_v2, %v1189_v1  ;;  %v421_v7 = vmul.f32 %v420_v6, %v1189_v1  ;;  %v321_v8 = vmul.f32 %v319_v2, %v1191_v3 }
  0x65   : > { %v423_v9 = vmul.f32 %v420_v6, %v310_v0  ;;  %v422_v10 = vmul.f32 %v420_v6, %v1191_v3  ;;  %v340_v11 = vstv %s770_s27  ;;  %v440_v14 = vstv %s774_s15  ;;  %s295_s27 = scalar_lea.vmem [#allocation9], %s766_s9  ;;  %s790_s15 = sshll.u32 %s1069_s25, 8 }
  0x66   : > { %330 = vrot.lane.b32.xlu1 %v322_v4, %s1006_s12  ;;  %326 = vrot.lane.b32.xlu0 %v320_v5, %s1006_s12  ;;  %v342_v12 = vmul.f32 %v340_v11, %v1191_v3  ;;  %v341_v13 = vmul.f32 %v340_v11, %v1189_v1  ;;  %v441_v15 = vmul.f32 %v440_v14, %v1189_v1  ;;  %v361_v19 = vstv %s771_s16 }
  0x67   : > { %v343_v16 = vmul.f32 %v340_v11, %v310_v0  ;;  %v443_v17 = vmul.f32 %v440_v14, %v310_v0  ;;  %v442_v18 = vmul.f32 %v440_v14, %v1191_v3  ;;  %v363_v20 = vmul.f32 %v361_v19, %v1191_v3 }
  0x68   : > { %v362_v21 = vmul.f32 %v361_v19, %v1189_v1  ;;  %v460_v22 = vstv %s775_s29  ;;  %v364_v24 = vmul.f32 %v361_v19, %v310_v0  ;;  %v313_v35 = vstv %s312_s14  ;;  %s1237_s29 = scalar_lea.hbm %s1298_s4, %s790_s15 }
  0x69   : > { %v461_v23 = vmul.f32 %v460_v22, %v1189_v1  ;;  %v463_v25 = vmul.f32 %v460_v22, %v310_v0  ;;  %v462_v26 = vmul.f32 %v460_v22, %v1191_v3  ;;  %v314_v39 = vmul.f32 %v313_v35, %v1189_v1 }
  0x6a   : > { %427 = vrot.lane.b32.xlu1 %v421_v7, %s1006_s12  ;;  %328 = vrot.lane.b32.xlu0 %v321_v8, %s1006_s12  ;;  %v315_v45 = vmul.f32 %v313_v35, %v1191_v3  ;;  %v414_v48 = vstv %s772_s18  ;;  %v382_v54 = vstv %s1205_s19  ;;  %v391_v6 = vrot.slane %v311_v56, %v390_v52  ;;  %s1009_s18 = smov [#allocation9]  }
  0x6b   : > { %v415_v58 = vmul.f32 %v414_v48, %v1189_v1  ;;  %v416_v59 = vmul.f32 %v414_v48, %v1191_v3  ;;  %v480_v19 = vstv %s1215_s7  ;;  %s931_s19 = sshll.u32 %s1009_s18, 4  ;;  %s932_s19 = int_to_ptr.vmem [resolvable:$false] %s931_s19 }
  0x6c   : > { %s933_s7 = scalar_lea.vmem %s932_s19, 1024 }
  0x6e   : > { %431 = vrot.lane.b32.xlu1 %v423_v9, %s1006_s12  ;;  %429 = vrot.lane.b32.xlu0 %v422_v10, %s1006_s12  ;;  %s524_s12 = sshll.u32 %s295_s27, 4  ;;  %s1231_s12 = int_to_ptr.vmem [resolvable:$true] %s524_s12 }
  0x6f   : > { %s927_s14 = scalar_lea.vmem %s1231_s12, 512  ;;  %p934_p7 = scmp.lt.s32.totalorder %s1231_s12, %s932_s19 }
  0x70   : > { %p928_p6 = scmp.ne.s32.totalorder %s1231_s12, %s927_s14  ;;  %p935_p12 = scmp.lt.s32.totalorder %s933_s7, %s927_s14 }
  0x72   : > { %349 = vrot.lane.b32.xlu1 %v342_v12, %s1007_s11  ;;  %347 = vrot.lane.b32.xlu0 %v341_v13, %s1007_s11  ;;  %v395_v12 = vrot.slane %v311_v56, %v394_v63  ;;  %p929_p13 = pnand %p928_p6, %p1127_p8  ;;  %p936_p0 = por %p935_p12, %p934_p7 }
  0x74   : > { %p930_p11 = pneg %p929_p13 }
  0x76   : > { %447 = vrot.lane.b32.xlu1 %v441_v15, %s1007_s11  ;;  %351 = vrot.lane.b32.xlu0 %v343_v16, %s1007_s11  ;;  %p937_p2 = pnand %p936_p0, %p930_p11 }
  0x7a   : > { %451 = vrot.lane.b32.xlu1 %v443_v17, %s1007_s11  ;;  %449 = vrot.lane.b32.xlu0 %v442_v18, %s1007_s11 }
  0x7e   : > { %370 = vrot.lane.b32.xlu1 %v363_v20, %s1008_s30  ;;  %368 = vrot.lane.b32.xlu0 %v362_v21, %s1008_s30 }
  0x82   : > { %467 = vrot.lane.b32.xlu1 %v461_v23, %s1008_s30  ;;  %372 = vrot.lane.b32.xlu0 %v364_v24, %s1008_s30 }
  0x86   : > { %471 = vrot.lane.b32.xlu1 %v463_v25, %s1008_s30  ;;  %469 = vrot.lane.b32.xlu0 %v462_v26, %s1008_s30  ;;  %s503_s30 = scalar_lea.sflag [#allocation4], %s1173_s17 }
  0xd8   : > { %v331_v27 = vpop.permute.xlu1 %330  ;;  %v327_v28 = vpop.permute.xlu0 %326 }
  0xdc   : > { %v428_v29 = vpop.permute.xlu1 %427  ;;  %v329_v30 = vpop.permute.xlu0 %328 }
  0xdd   : > { %v333_v40 = vsel %vm332_vm0, %v327_v28, %v329_v30  ;;  %v334_v47 = vsel %vm332_vm0, %v329_v30, %v331_v27 }
  0xde   : > { %v337_v46 = vadd.f32 %v333_v40, %v314_v39  ;;  %v338_v57 = vadd.f32 %v334_v47, %v315_v45 }
  0xe0   : > { %v432_v31 = vpop.permute.xlu1 %431  ;;  %v430_v32 = vpop.permute.xlu0 %429 }
  0xe1   : > { %v433_v61 = vsel %vm332_vm0, %v428_v29, %v430_v32  ;;  %v434_v62 = vsel %vm332_vm0, %v430_v32, %v432_v31 }
  0xe2   : > { %v437_v3 = vadd.f32 %v433_v61, %v415_v58  ;;  %v438_v9 = vadd.f32 %v434_v62, %v416_v59 }
  0xe4   : > { %v350_v33 = vpop.permute.xlu1 %349  ;;  %v348_v34 = vpop.permute.xlu0 %347 }
  0xe5   : > { %v354_v44 = vsel %vm353_vm1, %v348_v34, %v350_v33 }
  0xe6   : > { %v358_v49 = vadd.f32 %v354_v44, %v337_v46 }
  0xe8   : > { %v448_v36 = vpop.permute.xlu1 %447  ;;  %v352_v37 = vpop.permute.xlu0 %351 }
  0xe9   : > { %v355_v53 = vsel %vm353_vm1, %v350_v33, %v352_v37 }
  0xea   : > { %v359_v0 = vadd.f32 %v355_v53, %v338_v57 }
  0xec   : > { %v452_v41 = vpop.permute.xlu1 %451  ;;  %v450_v42 = vpop.permute.xlu0 %449 }
  0xed   : > { %v453_v7 = vsel %vm353_vm1, %v448_v36, %v450_v42  ;;  %v454_v8 = vsel %vm353_vm1, %v450_v42, %v452_v41 }
  0xee   : > { %v457_v13 = vadd.f32 %v453_v7, %v437_v3  ;;  %v458_v14 = vadd.f32 %v454_v8, %v438_v9 }
  0xf0   : > { %v371_v50 = vpop.permute.xlu1 %370  ;;  %v369_v51 = vpop.permute.xlu0 %368 }
  0xf1   : > { %v375_v55 = vsel %vm374_vm2, %v369_v51, %v371_v50 }
  0xf2   : > { %v379_v60 = vadd.f32 %v375_v55, %v358_v49 }
  0xf4   : > { %v383_v2 = vadd.f32 %v382_v54, %v379_v60  ;;  %v468_v4 = vpop.permute.xlu1 %467  ;;  %v373_v5 = vpop.permute.xlu0 %372 }
  0xf5   : > { %v376_v1 = vsel %vm374_vm2, %v371_v50, %v373_v5 }
  0xf6   : > { %v385_v10 = vmax.f32 %v383_v2, 0.0  ;;  %v380_v11 = vadd.f32 %v376_v1, %v359_v0 }
  0xf8   : > { %v384_v15 = vadd.f32 %v382_v54, %v380_v11  ;;  %v472_v16 = vpop.permute.xlu1 %471  ;;  %v470_v17 = vpop.permute.xlu0 %469  ;;  %v398_v18 = vmul.f32 %v391_v6, %v385_v10 }
  0xf9   : > { %v473_v20 = vsel %vm374_vm2, %v468_v4, %v470_v17  ;;  %v474_v21 = vsel %vm374_vm2, %v470_v17, %v472_v16 }
  0xfa   : > { %v386_v22 = vmax.f32 %v384_v15, 0.0  ;;  %v477_v23 = vadd.f32 %v473_v20, %v457_v13  ;;  %v478_v24 = vadd.f32 %v474_v21, %v458_v14  ;;  %400 = vst [vmem:[%s295_s27] sm:$0xff] %v398_v18  ;;  %v407_v28 = vmul.f32 %v398_v18, %v398_v18 }
  0xfc   : > { %v481_v25 = vadd.f32 %v480_v19, %v477_v23  ;;  %v482_v26 = vadd.f32 %v480_v19, %v478_v24  ;;  %v399_v27 = vmul.f32 %v395_v12, %v386_v22 }
  0xfe   : > { %v483_v29 = vmax.f32 %v481_v25, 0.0  ;;  %v484_v30 = vmax.f32 %v482_v26, 0.0  ;;  %v402_v31 = vadd.f32 %v399_v27, %v398_v18  ;;  %401 = vst [vmem:[%s295_s27 + $0x8] sm:$0xff] %v399_v27  ;;  %v408_v32 = vmul.f32 %v399_v27, %v399_v27 }
 0x100   : > { %403 = vadd.xlane.f32.xlu0 %v402_v31  ;;  %v409_v33 = vadd.f32 %v408_v32, %v407_v28  ;;  %v485_v34 = vmul.f32 %v483_v29, %v391_v6  ;;  %v486_v35 = vmul.f32 %v484_v30, %v395_v12 }
 0x102   : > { %410 = vadd.xlane.f32.xlu1 %v409_v33  ;;  %v490_v36 = vadd.f32 %v486_v35, %v485_v34  ;;  %777 = vst [vmem:[%s295_s27 + $0x10] sm:$0xff] %v485_v34  ;;  %778 = vst [vmem:[%s295_s27 + $0x18] sm:$0xff] %v486_v35  ;;  %v495_v37 = vmul.f32 %v485_v34, %v485_v34  ;;  %v496_v38 = vmul.f32 %v486_v35, %v486_v35 }
 0x104   : > { %491 = vadd.xlane.f32.xlu0 %v490_v36  ;;  %v497_v39 = vadd.f32 %v496_v38, %v495_v37 }
 0x108   : > { %498 = vadd.xlane.f32.xlu0 %v497_v39 }
 0x109   : > { %940 = shalt.err (!%p937_p2)
}
 0x10a   : > { %s941_s10 = scalar_lea.hbm %s1237_s29, 512  ;;  %s945_s27 = scalar_lea.hbm %s1298_s4, 1024 }
 0x10b   : > { %p942_p10 = scmp.ne.s32.totalorder %s1237_s29, %s941_s10  ;;  %p946_p3 = scmp.lt.u32.totalorder %s1237_s29, %s1298_s4 }
 0x10c   : > { %p947_p9 = scmp.lt.u32.totalorder %s945_s27, %s941_s10  ;;  %p949_p6 = scmp.lt.u32.totalorder %s941_s10, %s1237_s29 }
 0x10d   : > { %p943_p5 = pnand %p942_p10, %p1127_p8 }
 0x10e   : > { %p948_p4 = por %p947_p9, %p946_p3 }
 0x10f   : > { %p944_p1 = pneg %p943_p5 }
 0x110   : > { %p950_p13 = por %p949_p6, %p948_p4 }
 0x112   : > { %p951_p11 = pnand %p950_p13, %p944_p1 }
 0x114   : > { %954 = shalt.err (!%p951_p11)
}
 0x115   : > { %s1010_s11 = smov 256   ;;  %s1011_s14 = smov 512   ;;  %vm405_vm3 = vcmask 7168  }
 0x116   : > { %s1012_s18 = smov 16   ;;  %s767_s19 = sshll.u32 %s1173_s17, 4 }
 0x117   : > { %804 = dma.vmem_to_hbm [thread:$0]  (%p1127_p8), %s1231_s12, 512, %s1237_s29, %s503_s30, %s1010_s11, %s1011_s14, %s1012_s18  }
 0x118   : > { %s301_s7 = scalar_lea.vmem [#allocation10], %s767_s19  ;;  %s307_s10 = scalar_lea.vmem [#allocation11], %s767_s19 }
 0x119   : > { %s786_s8 = sshll.u32 (%p1127_p8), %s1069_s25, 3 }
 0x11a   : > { %s535_s29 = scalar_lea.vmem (%p1127_p8), %s1299_s5, %s786_s8 }
 0x18d   : > { %v404_v40 = vpop.xlane.xlu0 %403 }
 0x18e   : > { %406 = vst.msk [vmem:[%s301_s7] sm:$0xff] %vm405_vm3, %v404_v40 }
 0x18f   : > { %v411_v41 = vpop.xlane.xlu1 %410 }
 0x190   : > { %412 = vst.msk [vmem:[%s307_s10] sm:$0xff] %vm405_vm3, %v411_v41  ;;  %533 = sbr.rel (!%p1127_p8) target bundleno = 411 (0x19b), region = 56 }
 0x191   : > { %v492_v42 = vpop.xlane.xlu0 %491 }
 0x192   : > { %779 = vst.msk [vmem:[%s301_s7 + $0x8] sm:$0xff] %vm405_vm3, %v492_v42 }
 0x195   : > { %v499_v43 = vpop.xlane.xlu0 %498  ;;  %v565_v44 = vld [vmem:[%s301_s7] sm:$0xff] (%p1127_p8) }
 0x196   : > { %780 = vst.msk [vmem:[%s307_s10 + $0x8] sm:$0xff] %vm405_vm3, %v499_v43  ;;  %566 = vst [vmem:[%s535_s29] sm:$0xff] (%p1127_p8), %v565_v44 }
 0x199   : > { %v567_v45 = vld [vmem:[%s301_s7 + $0x8] sm:$0xff] }
 0x19a   : > { %568 = vst [vmem:[%s535_s29 + $0x10] sm:$0xff] %v567_v45 }
 0x19b PF: > { %574 = sbr.rel (!%p1127_p8) target bundleno = 419 (0x1a3), region = 94  ;;  %s787_s30 = sshll.u32 (%p1127_p8), %s1069_s25, 3  ;;  %v606_v46 = vld [vmem:[%s307_s10] sm:$0xff] (%p1127_p8) }
 0x19c   : > { %s576_s15 = scalar_lea.vmem (%p1127_p8), %s1300_s6, %s787_s30 }
 0x19d   : > { %607 = vst [vmem:[%s576_s15] sm:$0xff] (%p1127_p8), %v606_v46 }
 0x1a1   : > { %v608_v47 = vld [vmem:[%s307_s10 + $0x8] sm:$0xff] (%p1127_p8) }
 0x1a2   : > { %609 = vst [vmem:[%s576_s15 + $0x10] sm:$0xff] %v608_v47 }
 0x1a3 PF: > { %s621_s16 = sand.u32 1, %s989_s21   ;;  %p1317_p7 = scmp.ne.s32.totalorder %s1305_s28, 0 }
 0x1a4   : > { %p1318_p12 = scmp.ge.s32.totalorder %s1001_s24, 2  ;;  %s622_s26 = scalar_lea.sflag [#allocation4], %s621_s16 }
 0x1a6   : > { %p818_p0 = pnand %p1318_p12, %p1317_p7 }
 0x1a8   : > { %984 = dma.done.wait (!%p818_p0), %s622_s26, 512  }
 0x1a9   : > { %986 = vsyncadd (!%p818_p0), %s622_s26, 4294966784  ;;  %p22_p8 = scmp.ge.s32.totalorder %s1108_s13, 4   ;;  %s1319_s21 = smov %s993_s22 }
 0x1aa   : > { %s1320_s22 = smov %s997_s23  ;;  %s1321_s23 = smov %s1123_s20 }
 0x1ab   : > { %s1322_s24 = smov %s1108_s13  ;;  %24 = sbr.rel (!%p22_p8) target bundleno = 7 (0x7), region = 193 }
 0x1b2   :  { %641 = vsyncpa [#allocation3], 1 }
 0x1b3   :  { %643 = vsyncpa [#allocation3 + $0x1], 1 }
 0x1b4   :  { %644 = vsyncpa [#allocation4], 1 }
 0x1b5   :  { %646 = vsyncpa [#allocation4 + $0x1], 1 }
 0x1b6   :  { %647 = vsyncpa [#allocation5], 1 }
 0x1b7   :  { %649 = vsyncpa [#allocation5 + $0x1], 1 }
 0x1b8   :  { %650 = vsyncpa [#allocation8], 1 }

</bundles_post_ra>
